<compile_context>
chip_gen: v7x
topology: tpu7x:2x2x1
jax: 0.10.0
libtpu: 0.0.40
codegen_flags: <defaults>
</compile_context>

<pallas_src>
import math
import jax
import jax.numpy as jnp
from jax.experimental import pallas as pl
from jax.experimental.pallas import tpu as pltpu


def _round_up(a: int, b: int) -> int:
    return ((a + b - 1) // b) * b


def _chip_limits():
    """Per-generation VMEM budget / tile caps / TC count (proxy: VMEM size)."""
    try:
        vmem_cap = int(pltpu.get_tpu_info().vmem_capacity_bytes)
    except Exception:
        vmem_cap = 64 << 20  # be conservative (v7x-sized) if query unavailable
    if vmem_cap <= (64 << 20):
        # v7x-class: 64 MiB VMEM per TensorCore, 2 TCs per chip.
        return dict(vmem_limit_cap=48 << 20, tm_cap=512, tn_cap=512,
                    tk_cap=512, two_tc=True)
    # v5e / v6e: 128 MiB VMEM, 1 TensorCore.
    return dict(vmem_limit_cap=100 << 20, tm_cap=1024, tn_cap=512,
                tk_cap=1024, two_tc=False)


# ----------------------------- kernels --------------------------------------


def _resident_k_kernel(x_ref, w_ref, b_ref, o_ref):
    # x: [TM, V], w: [V, TN] (VMEM-resident across the inner M loop), b: [1, TN]
    acc = jnp.dot(x_ref[...], w_ref[...], preferred_element_type=jnp.float32)
    o_ref[...] = (acc + b_ref[...]).astype(o_ref.dtype)


def _tiled_kernel(x_ref, w_ref, b_ref, o_ref, acc_ref):
    k = pl.program_id(2)

    @pl.when(k == 0)
    def _():
        acc_ref[...] = jnp.zeros_like(acc_ref)

    acc_ref[...] += jnp.dot(
        x_ref[...], w_ref[...], preferred_element_type=jnp.float32
    )

    @pl.when(k == pl.num_programs(2) - 1)
    def _():
        # Bias added once per output tile, f32 epilogue (v5e-friendly).
        o_ref[...] = (acc_ref[...] + b_ref[...]).astype(o_ref.dtype)


# ----------------------------- wrappers --------------------------------------


def prepare_linear_embedding_params(weight_dv, bias_d, compute_dtype=jnp.bfloat16):
    """One-time parameter prep (hoisted out of the per-call hot path).

    weight_dv: torch nn.Linear layout [D, V]. Returns (w_vd [V, D] in
    compute_dtype (or f32 if compute_dtype is None), bias as f32 [1, D]).
    """
    w_vd = jnp.asarray(weight_dv).T
    if compute_dtype is not None:
        w_vd = w_vd.astype(compute_dtype)
    b_row = jnp.asarray(bias_d).astype(jnp.float32).reshape(1, -1)
    return w_vd, b_row


def linear_embeddings(x, w_vd, b_row, *, force_tiled=False):
    """Pallas equivalent of LinearEmbeddings.forward (eval mode).

    x:     [B, S, V]
    w_vd:  [V, D]  (pre-prepared; its dtype is the MXU compute dtype)
    b_row: [1, D]  float32
    returns [B, S, D] in x.dtype
    """
    B, S, V = x.shape
    Vw, D = w_vd.shape
    assert Vw == V, f"weight vocab dim {Vw} != input vocab dim {V}"
    M = B * S
    out_dtype = x.dtype
    compute_dtype = w_vd.dtype
    in_b = jnp.dtype(compute_dtype).itemsize
    out_b = jnp.dtype(out_dtype).itemsize
    align = 16 if in_b == 2 else (32 if in_b == 1 else 8)

    lim = _chip_limits()
    budget = lim["vmem_limit_cap"] - (4 << 20)

    x2d = x.reshape(M, V)
    if x2d.dtype != compute_dtype:
        x2d = x2d.astype(compute_dtype)  # one cheap pass; halves HBM reads for bf16

    cost = pl.CostEstimate(
        flops=2 * M * V * D,
        transcendentals=0,
        bytes_accessed=in_b * (M * V + V * D) + out_b * M * D + 4 * D,
    )

    # ---------------- fast path: contraction (V) fully in-block ----------------
    TN = D if D <= lim["tn_cap"] else lim["tn_cap"]
    Dp = D if TN == D else _round_up(D, TN)
    min_fp = (2 * align * V * in_b + 2 * V * TN * in_b
              + 2 * TN * 4 + 2 * align * TN * out_b)
    use_fast = (not force_tiled) and (min_fp <= budget)

    if use_fast:
        # Adaptive TM: minimal M padding subject to the per-generation cap.
        if M <= lim["tm_cap"]:
            TM = _round_up(M, align)
        else:
            TM, best_waste = lim["tm_cap"], None
            tm = lim["tm_cap"]
            while tm >= 128:
                waste = _round_up(M, tm) - M
                if best_waste is None or waste < best_waste:
                    TM, best_waste = tm, waste
                tm //= 2

        def fp(tm):
            return (2 * tm * V * in_b + 2 * V * TN * in_b
                    + 2 * TN * 4 + 2 * tm * TN * out_b)

        while TM > align and fp(TM) > budget:
            TM = max(align, _round_up(TM // 2, align))
        Mp = _round_up(M, TM)

        # v7x: make sure both TensorCores get work on the parallel axes.
        if lim["two_tc"] and (Mp // TM) * (Dp // TN) < 2 and TM >= 2 * align:
            TM = _round_up(-(-M // 2), align)
            Mp = _round_up(M, TM)

        if Mp != M:  # minimal M-only padding; V is never padded here
            x2d = jnp.pad(x2d, ((0, Mp - M), (0, 0)))
        w_p, b_p = w_vd, b_row
        if Dp != D:
            # TODO(synk): hoist this one-time D padding into param prep.
            w_p = jnp.pad(w_vd, ((0, 0), (0, Dp - D)))
            b_p = jnp.pad(b_row, ((0, 0), (0, Dp - D)))

        gm, gn = Mp // TM, Dp // TN
        vmem_limit = min(lim["vmem_limit_cap"],
                         max(32 << 20, int(fp(TM) * 1.5) + (2 << 20)))

        out = pl.pallas_call(
            _resident_k_kernel,
            out_shape=jax.ShapeDtypeStruct((Mp, Dp), out_dtype),
            grid_spec=pltpu.PrefetchScalarGridSpec(
                num_scalar_prefetch=0,
                grid=(gn, gm),  # m innermost -> W column stays VMEM-resident
                in_specs=[
                    pl.BlockSpec((TM, V), lambda j, i: (i, 0)),
                    pl.BlockSpec((V, TN), lambda j, i: (0, j)),  # constant in i
                    pl.BlockSpec((1, TN), lambda j, i: (0, j)),
                ],
                out_specs=pl.BlockSpec((TM, TN), lambda j, i: (i, j)),
            ),
            compiler_params=pltpu.CompilerParams(
                dimension_semantics=("parallel", "parallel"),
                vmem_limit_bytes=vmem_limit,
            ),
            cost_estimate=cost,
        )(x2d, w_p, b_p)

        if Mp != M or Dp != D:
            out = out[:M, :D]
        return out.reshape(B, S, D)

    # ------------- tiled fallback (vocab too large for resident W column) -------------
    TN = min(lim["tn_cap"], _round_up(D, 128))
    TK = min(lim["tk_cap"], _round_up(V, 128))
    TM = min(lim["tm_cap"], _round_up(M, align))
    Dp = _round_up(_round_up(D, 128), TN)
    Vp = _round_up(_round_up(V, 128), TK)
    Mp = _round_up(M, TM)

    def fp3(tm, tn, tk):
        return (2 * tm * tk * in_b + 2 * tk * tn * in_b + 2 * tn * 4
                + 2 * tm * tn * out_b + tm * tn * 4)

    while TM > align and fp3(TM, TN, TK) > budget:
        TM = max(align, _round_up(TM // 2, align))
        Mp = _round_up(M, TM)

    if lim["two_tc"] and (Mp // TM) * (Dp // TN) < 2 and TM >= 2 * align:
        TM = _round_up(-(-M // 2), align)
        Mp = _round_up(M, TM)

    # x is only padded along K when V is not already 128-aligned (rare for real
    # vocab sizes on this path); W/b padding is one-time and small.
    x_p = x2d if (Mp == M and Vp == V) else jnp.pad(x2d, ((0, Mp - M), (0, Vp - V)))
    w_p = w_vd if (Vp == V and Dp == D) else jnp.pad(w_vd, ((0, Vp - V), (0, Dp - D)))
    b_p = b_row if Dp == D else jnp.pad(b_row, ((0, 0), (0, Dp - D)))

    vmem_limit = min(lim["vmem_limit_cap"],
                     max(32 << 20, int(fp3(TM, TN, TK) * 1.5) + (2 << 20)))

    out = pl.pallas_call(
        _tiled_kernel,
        out_shape=jax.ShapeDtypeStruct((Mp, Dp), out_dtype),
        grid_spec=pltpu.PrefetchScalarGridSpec(
            num_scalar_prefetch=0,
            grid=(Mp // TM, Dp // TN, Vp // TK),
            in_specs=[
                pl.BlockSpec((TM, TK), lambda i, j, k: (i, k)),
                pl.BlockSpec((TK, TN), lambda i, j, k: (k, j)),
                pl.BlockSpec((1, TN), lambda i, j, k: (0, j)),
            ],
            out_specs=pl.BlockSpec((TM, TN), lambda i, j, k: (i, j)),
            scratch_shapes=[pltpu.VMEM((TM, TN), jnp.float32)],
        ),
        compiler_params=pltpu.CompilerParams(
            dimension_semantics=("parallel", "parallel", "arbitrary"),
            vmem_limit_bytes=vmem_limit,
        ),
        cost_estimate=cost,
    )(x_p, w_p, b_p)

    if Mp != M or Dp != D:
        out = out[:M, :D]
    return out.reshape(B, S, D)


# ----------------------------- demo / checks ---------------------------------

if __name__ == "__main__":
    # Small shapes consistent with the module: vocab_size=32, d_model=64.
    B, S, V, D = 2, 8, 32, 64
    dropout_p = 0.1  # identity at inference (eval mode)

    key = jax.random.PRNGKey(0)
    kx, kw, kb = jax.random.split(key, 3)

    bound = 1.0 / math.sqrt(V)
    weight_dv = jax.random.uniform(kw, (D, V), jnp.float32, -bound, bound)  # torch [D, V]
    bias_d = jax.random.uniform(kb, (D,), jnp.float32, -bound, bound)
    x = jax.random.normal(kx, (B, S, V), dtype=jnp.float32)

    y_ref = x @ weight_dv.T + bias_d

    # 1) Default bf16 MXU path (params prepared / cast once, outside the hot path).
    w_bf16, b_row = prepare_linear_embedding_params(weight_dv, bias_d, jnp.bfloat16)
    y = jax.block_until_ready(linear_embeddings(x, w_bf16, b_row))
    assert y.shape == (B, S, D) and y.dtype == x.dtype
    # Tight check against the same bf16-rounded operands (f32 accumulation).
    y_bf_ref = (x.astype(jnp.bfloat16).astype(jnp.float32)
                @ w_bf16.astype(jnp.float32)) + bias_d
    assert jnp.allclose(y, y_bf_ref, atol=2e-3, rtol=2e-3)
    # Loose check against the exact f32 reference (bf16 input rounding only).
    assert jnp.allclose(y, y_ref, atol=5e-2, rtol=5e-2)

    # 2) Exact f32 path matches the PyTorch-style reference tightly.
    w_f32, b_row32 = prepare_linear_embedding_params(weight_dv, bias_d, None)
    y32 = jax.block_until_ready(linear_embeddings(x, w_f32, b_row32))
    assert jnp.allclose(y32, y_ref, atol=1e-5, rtol=1e-5)

    # 3) Exercise the tiled fallback path (large-vocab configuration).
    V2, D2, B2, S2 = 2048, 256, 2, 16
    k2x, k2w, k2b = jax.random.split(jax.random.PRNGKey(1), 3)
    b2v = 1.0 / math.sqrt(V2)
    w2_dv = jax.random.uniform(k2w, (D2, V2), jnp.float32, -b2v, b2v)
    b2 = jax.random.uniform(k2b, (D2,), jnp.float32, -b2v, b2v)
    x2 = jax.random.normal(k2x, (B2, S2, V2), dtype=jnp.float32)
    w2_bf16, b2_row = prepare_linear_embedding_params(w2_dv, b2, jnp.bfloat16)
    y2 = jax.block_until_ready(linear_embeddings(x2, w2_bf16, b2_row, force_tiled=True))
    y2_ref = (x2.astype(jnp.bfloat16).astype(jnp.float32)
              @ w2_bf16.astype(jnp.float32)) + b2
    assert y2.shape == (B2, S2, D2)
    assert jnp.allclose(y2, y2_ref, atol=5e-3, rtol=5e-3)

    print("KERNEL_OK")
</pallas_src>

<mosaic_0001>
module attributes {stable_mosaic.version = 11 : i64} {
  func.func @_resident_k_kernel(%arg0: i32, %arg1: i32, %arg2: memref<16x32xbf16, #tpu.memory_space<vmem>>, %arg3: memref<32x64xbf16, #tpu.memory_space<vmem>>, %arg4: memref<1x64xf32, #tpu.memory_space<vmem>>, %arg5: memref<16x64xf32, #tpu.memory_space<vmem>>) attributes {dimension_semantics = [#tpu.dimension_semantics<parallel>, #tpu.dimension_semantics<parallel>], iteration_bounds = array<i64: 1, 1>, scalar_prefetch = 0 : i64, scratch_operands = 0 : i64, tpu.core_type = #tpu.core_type<tc>, window_params = [{transform_indices = @transform_0, window_bounds = array<i64: 16, 32>}, {transform_indices = @transform_1, window_bounds = array<i64: 32, 64>}, {transform_indices = @transform_2, window_bounds = array<i64: 1, 64>}, {transform_indices = @transform_3, window_bounds = array<i64: 16, 64>}]} {
    %c0 = arith.constant 0 : index
    %c0_0 = arith.constant 0 : index
    %0 = vector.load %arg2[%c0, %c0_0] : memref<16x32xbf16, #tpu.memory_space<vmem>>, vector<16x32xbf16>
    %c0_1 = arith.constant 0 : index
    %c0_2 = arith.constant 0 : index
    %1 = vector.load %arg3[%c0_1, %c0_2] : memref<32x64xbf16, #tpu.memory_space<vmem>>, vector<32x64xbf16>
    %cst = arith.constant dense<0.000000e+00> : vector<16x64xf32>
    %2 = tpu.matmul %0, %1, %cst {dimension_numbers = #tpu.dot_dimension_numbers<[1], [0], [0], [1], [0, 0, 1, 1], [], []>} : vector<16x32xbf16>, vector<32x64xbf16>, vector<16x64xf32> -> vector<16x64xf32>
    %c0_3 = arith.constant 0 : index
    %c0_4 = arith.constant 0 : index
    %3 = vector.load %arg4[%c0_3, %c0_4] : memref<1x64xf32, #tpu.memory_space<vmem>>, vector<1x64xf32>
    %4 = vector.broadcast %3 : vector<1x64xf32> to vector<16x64xf32>
    %5 = arith.addf %2, %4 : vector<16x64xf32>
    %c0_5 = arith.constant 0 : index
    %c0_6 = arith.constant 0 : index
    %6 = vector.load %arg5[%c0_5, %c0_6] : memref<16x64xf32, #tpu.memory_space<vmem>>, vector<16x64xf32>
    tpu.vector_store %arg5[%c0_5, %c0_6], %5 {strides = array<i32>} : memref<16x64xf32, #tpu.memory_space<vmem>>, vector<16x64xf32>,
    return
  }
  func.func @transform_0(%arg0: i32, %arg1: i32) -> (i32, i32) {
    %c0_i32 = arith.constant 0 : i32
    %c0_i32_0 = arith.constant 0 : i32
    return %arg1, %c0_i32 : i32, i32
  }
  func.func @transform_1(%arg0: i32, %arg1: i32) -> (i32, i32) {
    %c0_i32 = arith.constant 0 : i32
    %c0_i32_0 = arith.constant 0 : i32
    return %c0_i32, %arg0 : i32, i32
  }
  func.func @transform_2(%arg0: i32, %arg1: i32) -> (i32, i32) {
    %c0_i32 = arith.constant 0 : i32
    %c0_i32_0 = arith.constant 0 : i32
    return %c0_i32, %arg0 : i32, i32
  }
  func.func @transform_3(%arg0: i32, %arg1: i32) -> (i32, i32) {
    %c0_i32 = arith.constant 0 : i32
    return %arg1, %arg0 : i32, i32
  }
}

</mosaic_0001>

<bundles_post_ra>
// kernel: tpu_custom_call.1
= control target key start
LH: loop header
LB: loop body
LE: loop exit
PB: predicated region body
PF: predicated region fallthrough
CT: control target
= control target key end

     0   :  { %8 = vsyncpa [#allocation3], 0  ;;  %s308_s0 = inlined_call_operand.hbm [shape: bf16[16,32], index: 0, kind: input, shape index: {}]   ;;  %s309_s1 = inlined_call_operand.hbm [shape: bf16[32,64], index: 1, kind: input, shape index: {}]   ;;  %s310_s2 = inlined_call_operand.vmem [shape: f32[1,64], index: 2, kind: input, shape index: {}]   ;;  %s311_s3 = inlined_call_operand.hbm [shape: f32[16,64], index: 3, kind: output, shape index: {}]  }
   0x1   :  { %9 = vsyncpa [#allocation6], 0 }
   0x2   :  { %10 = vsyncpa [#allocation4], 0  ;;  %s240_s12 = smov [#allocation2]   ;;  %s168_s16 = scalar_lea.hbm %s308_s0, 128 }
   0x3   :  { %s16_s13 = sshll.u32 %s240_s12, 4  ;;  %p169_p0 = scmp.ne.s32.totalorder %s308_s0, %s168_s16  ;;  %s17_s13 = int_to_ptr.vmem [resolvable:$true] %s16_s13 }
   0x4   :  { %p172_p1 = scmp.lt.u32.totalorder %s168_s16, %s308_s0 }
   0x6   :  { %p174_p2 = pnand %p172_p1, %p169_p0 }
   0x8   :  { %177 = shalt.err (!%p174_p2)
}
   0x9   :  { %s178_s21 = scalar_lea.vmem %s17_s13, 128  ;;  %p183_p4 = scmp.lt.s32.totalorder %s17_s13, %s17_s13 }
   0xa   :  { %p179_p3 = scmp.ne.s32.totalorder %s17_s13, %s178_s21  ;;  %p184_p5 = scmp.lt.s32.totalorder %s178_s21, %s178_s21 }
   0xc   :  { %p185_p6 = por %p184_p5, %p183_p4 }
   0xe   :  { %p186_p7 = pnand %p185_p6, %p179_p3 }
  0x10   :  { %189 = shalt.err (!%p186_p7)
}
  0x11   :  { %s241_s22 = smov 64   ;;  %s242_s23 = smov 4  }
  0x12   :  { %22 = dma.hbm_to_vmem [thread:$0]  %s308_s0, 128, %s17_s13, [#allocation3], %s241_s22, %s241_s22, %s242_s23  }
  0x13   :  { %s243_s26 = smov [#allocation5]   ;;  %s190_s30 = scalar_lea.hbm %s309_s1, 256 }
  0x14   :  { %s28_s27 = sshll.u32 %s243_s26, 4  ;;  %p191_p8 = scmp.ne.s32.totalorder %s309_s1, %s190_s30  ;;  %s29_s27 = int_to_ptr.vmem [resolvable:$true] %s28_s27 }
  0x15   :  { %p194_p9 = scmp.lt.u32.totalorder %s190_s30, %s309_s1 }
  0x17   :  { %p196_p10 = pnand %p194_p9, %p191_p8 }
  0x19   :  { %199 = shalt.err (!%p196_p10)
}
  0x1a   :  { %s200_s8 = scalar_lea.vmem %s29_s27, 256  ;;  %p205_p12 = scmp.lt.s32.totalorder %s29_s27, %s29_s27 }
  0x1b   :  { %p201_p11 = scmp.ne.s32.totalorder %s29_s27, %s200_s8  ;;  %p206_p13 = scmp.lt.s32.totalorder %s200_s8, %s200_s8 }
  0x1d   :  { %p207_p0 = por %p206_p13, %p205_p12 }
  0x1f   :  { %p208_p1 = pnand %p207_p0, %p201_p11 }
  0x21   :  { %211 = shalt.err (!%p208_p1)
}
  0x22   :  { %34 = dma.hbm_to_vmem [thread:$0]  %s309_s1, 256, %s29_s27, [#allocation6], %s241_s22, %s241_s22, %s242_s23  }
  0x23   :  { %234 = dma.done.wait [#allocation3], 128  }
  0x24   :  { %235 = vsyncadd [#allocation3], 4294967168 }
  0x25   :  { %236 = dma.done.wait [#allocation6], 256  }
  0x26   :  { %237 = vsyncadd [#allocation6], 4294967040  ;;  %v244_v0 = vmov 0.0   ;;  %vm245_vm0 = vmmov 0   ;;  %v165_v1 = vld [vmem:[#allocation5] sm:$0xff]   ;;  %v166_v2 = vld [vmem:[#allocation5 + $0x8] sm:$0xff]  }
  0x27   :  { %148 = vmatprep.subr.bf16.mxu0 %v244_v0  ;;  %152 = vmatprep.mubr.msk.bf16.mxu0 %vm245_vm0, %v244_v0  ;;  %v167_v3 = vld [vmem:[#allocation2] sm:$0xff]   ;;  %vm74_vm1 = vcmask 261120   ;;  %s246_s1 = smov [#allocation7]   ;;  %vm119_vm2 = vcmask 523264  }
  0x28   :  { %149 = vmatpush3.bf16.msra.mxu0 %v165_v1  ;;  %v140_v4 = vld [vmem:[%s310_s2] ss:$0 sm:$0xff]  ;;  %s127_s12 = sshll.u32 %s246_s1, 4  ;;  %s128_s12 = int_to_ptr.vmem [resolvable:$true] %s127_s12 }
  0x29   :  { %150 = vmatprep.subr.bf16.mxu0 %v244_v0  ;;  %s212_s13 = scalar_lea.vmem %s128_s12, 256  ;;  %p217_p3 = scmp.lt.s32.totalorder %s128_s12, %s128_s12 }
  0x2a   :  { %p213_p2 = scmp.ne.s32.totalorder %s128_s12, %s212_s13  ;;  %p218_p4 = scmp.lt.s32.totalorder %s212_s13, %s212_s13 }
  0x2c   :  { %151 = vmatpush3.bf16.msra.mxu0 %v166_v2  ;;  %p219_p5 = por %p218_p4, %p217_p3 }
  0x2e   :  { %p220_p6 = pnand %p219_p5, %p213_p2 }
  0x2f   :  { %153 = vmatmul.mubr.msk.bf16.vlgmr.msra.gmra.mrb[0].mxu0 %vm74_vm1, %v167_v3 }
 0x102   :  { %v112_v5 = vpop.f32.mrb[0].mxu0 }
 0x103   :  { %v113_v6 = vadd.f32 %v140_v4, %v112_v5  ;;  %v154_v7 = vpop.f32.mrb[1].mxu0 }
 0x104   :  { %v115_v8 = vpop.f32.mrb[2].mxu0 }
 0x105   :  { %120 = vst.msk [vmem:[#allocation7] sm:$0xff] %vm119_vm2, %v113_v6  ;;  %v116_v9 = vadd.f32 %v140_v4, %v115_v8  ;;  %v155_v10 = vpop.f32.mrb[3].mxu0 }
 0x107   :  { %121 = vst.msk [vmem:[#allocation7 + $0x8] sm:$0xff] %vm119_vm2, %v116_v9 }
 0x108   :  { %223 = shalt.err (!%p220_p6)
}
 0x109   :  { %s224_s15 = scalar_lea.hbm %s311_s3, 256 }
 0x10a   :  { %p225_p7 = scmp.ne.s32.totalorder %s311_s3, %s224_s15  ;;  %p228_p8 = scmp.lt.u32.totalorder %s224_s15, %s311_s3 }
 0x10c   :  { %p230_p9 = pnand %p228_p8, %p225_p7 }
 0x10e   :  { %233 = shalt.err (!%p230_p9)
}
 0x10f   :  { %s247_s20 = smov 128   ;;  %s248_s21 = smov 8  }
 0x110   :  { %133 = dma.vmem_to_hbm [thread:$0]  %s128_s12, 256, %s311_s3, [#allocation4], %s247_s20, %s247_s20, %s248_s21  }
 0x111   :  { %238 = dma.done.wait [#allocation4], 256  }
 0x112   :  { %239 = vsyncadd [#allocation4], 4294967040 }
 0x113   :  { %137 = vsyncpa [#allocation3], 1 }
 0x114   :  { %138 = vsyncpa [#allocation6], 1 }
 0x115   :  { %139 = vsyncpa [#allocation4], 1 }

</bundles_post_ra>
